<compile_context>
chip_gen: v7x
topology: tpu7x:2x2x1
jax: 0.10.0
libtpu: 0.0.40
codegen_flags: <defaults>
</compile_context>

<pallas_src>
import functools

import jax
import jax.numpy as jnp
import numpy as np
from jax.experimental import pallas as pl
from jax.experimental.pallas import tpu as pltpu

_LPAD = 128          # max supported dep/ex list length (one lane segment each)


# ----------------------------------------------------------------------------
# Fused Pallas kernel
# ----------------------------------------------------------------------------
def _make_lcp_kernel(n_rows, tile_n, n_tiles, dep_len, ex_len, alpha):
    """Build the kernel body with static shapes / config baked in."""
    needs_row_mask = (n_rows % tile_n) != 0

    def kernel(pred_ref, sel_ref, out_ref, num_acc, den_acc):
        step = pl.program_id(0)

        @pl.when(step == 0)
        def _init():
            num_acc[...] = jnp.zeros_like(num_acc)
            den_acc[...] = jnp.zeros_like(den_acc)

        pred = pred_ref[...]
        if needs_row_mask:
            # Last tile may read past N: zero the invalid rows before counting.
            rows_left = n_rows - step * tile_n
            row_ids = jax.lax.broadcasted_iota(jnp.int32, (tile_n, 1), 0)
            pred = jnp.where(row_ids < rows_left, pred, jnp.zeros_like(pred))
        pred = pred.astype(jnp.bfloat16)          # exact for 0/1 predictions

        # One wide MXU matmul: [TN, C] @ [C, 4*LPAD] -> [TN, 4*LPAD] (f32 acc).
        prods = jnp.dot(pred, sel_ref[...], preferred_element_type=jnp.float32)
        group_sums = prods[:, : 2 * _LPAD]        # [TN, 256]  dep | ex
        attr_vals = prods[:, 2 * _LPAD:]          # [TN, 256]  dep | ex  (0/1)

        # denominator contribution = attr_vals (already 0/1);
        # numerator contribution  = attr_vals where the group fired.
        den_contrib = attr_vals.astype(jnp.bfloat16)
        num_contrib = jnp.where(group_sums > 0.0, attr_vals,
                                0.0).astype(jnp.bfloat16)

        # Batch reduction on the MXU (all 8 output rows identical).
        ones = jnp.ones((8, tile_n), jnp.bfloat16)
        num_acc[...] += jnp.dot(ones, num_contrib,
                                preferred_element_type=jnp.float32)
        den_acc[...] += jnp.dot(ones, den_contrib,
                                preferred_element_type=jnp.float32)

        @pl.when(step == n_tiles - 1)
        def _finalize():
            numer = num_acc[0:1, :]               # [1, 256]
            denom = den_acc[0:1, :]
            idx = jax.lax.broadcasted_iota(jnp.int32, (1, _LPAD), 1)
            idxf = idx.astype(jnp.float32)
            big = jnp.float32(1e9)

            def seg_p(nm, dn, length):
                # p list in torch is [0.0]*k + [num_k/den_k] -> mean = val/(k+1)
                if length == 0:
                    return jnp.full((1, 1), jnp.nan, jnp.float32)  # mean([])
                valid = jnp.logical_and(idx < length, dn > 0.0)
                k = jnp.min(jnp.where(valid, idxf, big),
                            axis=1, keepdims=True)                 # [1,1]
                found = k < big
                val = nm / jnp.maximum(dn, 1.0) / (idxf + 1.0)
                pick = jnp.logical_and(valid, idxf == k)
                p = jnp.sum(jnp.where(pick, val, 0.0),
                            axis=1, keepdims=True)                 # [1,1]
                return jnp.where(found, p, 0.0)

            pdep = seg_p(numer[:, :_LPAD], denom[:, :_LPAD], dep_len)
            pex = seg_p(numer[:, _LPAD:], denom[:, _LPAD:], ex_len)
            loss = (1.0 - pdep + pex * alpha) ** 2

            # Pack [loss | pdep | pex | 0...] into one lane-dense (1,128) row.
            lane = jax.lax.broadcasted_iota(jnp.int32, (1, _LPAD), 1)
            out_ref[...] = jnp.where(
                lane == 0, loss,
                jnp.where(lane == 1, pdep,
                          jnp.where(lane == 2, pex, 0.0)))

    return kernel


def _lcp_forward(predictions, sel, dep_len, ex_len, alpha, tile_n=None):
    n, c = predictions.shape
    if tile_n is None:
        # Single full-array tile for small batches; 512-row tiles (multiple of
        # 8) for large batches so VMEM use is independent of N and fits v7x's
        # 64 MiB VMEM with double-buffered inputs.
        tile_n = n if n <= 1024 else 512
    n_tiles = -(-n // tile_n)

    kernel = _make_lcp_kernel(n, tile_n, n_tiles, dep_len, ex_len, alpha)

    out = pl.pallas_call(
        kernel,
        out_shape=jax.ShapeDtypeStruct((1, _LPAD), jnp.float32),
        grid_spec=pltpu.PrefetchScalarGridSpec(
            num_scalar_prefetch=0,
            grid=(n_tiles,),
            in_specs=[
                pl.BlockSpec((tile_n, c), lambda i: (i, 0)),      # streamed
                pl.BlockSpec((c, 4 * _LPAD), lambda i: (0, 0)),   # resident
            ],
            out_specs=pl.BlockSpec((1, _LPAD), lambda i: (0, 0)),
            scratch_shapes=[
                pltpu.VMEM((8, 2 * _LPAD), jnp.float32),   # numerator counts
                pltpu.VMEM((8, 2 * _LPAD), jnp.float32),   # denominator counts
            ],
        ),
        compiler_params=pltpu.CompilerParams(
            dimension_semantics=("arbitrary",),   # batch axis is a reduction
            vmem_limit_bytes=32 * 1024 * 1024,
        ),
    )(predictions, sel)
    return out[0, 0], out[0, 1], out[0, 2]


# ----------------------------------------------------------------------------
# Module wrapper
# ----------------------------------------------------------------------------
class LCPLossPallas:
    """JAX/Pallas equivalent of models/lcploss.py::LCPLoss.

    Contract: predictions are binary (exactly 0.0 / 1.0), matching how the
    torch reference tests `results[:, attr] == 1`.
    """

    def __init__(self, config, tile_n=None):
        self.ex_given_attrs = list(config["ex_given_attrs"])
        self.ex_groups = [list(g) for g in config["ex_groups"]]
        self.dep_given_attrs = list(config["dep_given_attrs"])
        self.dep_groups = [list(g) for g in config["dep_groups"]]
        self.ex_len = len(self.ex_given_attrs)
        self.dep_len = len(self.dep_given_attrs)
        self.alpha = float(config["alpha"])
        self.num_attrs = int(config["num_attrs"])
        self._tile_n = tile_n
        # config.batch_size / out_index / group_head_tail_indexes are unused
        # by forward(); not carried.

        assert self.dep_len <= _LPAD and self.ex_len <= _LPAD, (
            "dep/ex attribute lists longer than 128 are not supported")
        for a in self.dep_given_attrs + self.ex_given_attrs:
            assert 0 <= a < self.num_attrs, "attr index out of range"
        for grp in self.dep_groups + self.ex_groups:
            for cidx in grp:
                assert 0 <= cidx < self.num_attrs, "group index out of range"

        # Fused selection matrix [C, 4*LPAD] = [dep_GT | ex_GT | dep_AT | ex_AT]
        sel = np.zeros((self.num_attrs, 4 * _LPAD), dtype=np.float32)
        for i, (a, grp) in enumerate(zip(self.dep_given_attrs, self.dep_groups)):
            sel[a, 2 * _LPAD + i] = 1.0            # dep attr one-hot
            for cidx in grp:
                sel[cidx, i] = 1.0                 # dep group membership
        for i, (a, grp) in enumerate(zip(self.ex_given_attrs, self.ex_groups)):
            sel[a, 3 * _LPAD + i] = 1.0            # ex attr one-hot
            for cidx in grp:
                sel[cidx, _LPAD + i] = 1.0         # ex group membership
        self._sel = jnp.asarray(sel, dtype=jnp.bfloat16)   # 0/1 -> exact

    @functools.partial(jax.jit, static_argnums=(0, 2))
    def forward(self, predictions, ask_in_ex=False):
        loss, pdep, pex = _lcp_forward(
            predictions, self._sel, self.dep_len, self.ex_len, self.alpha,
            self._tile_n)
        # TODO(synk): torch also returns mi = tensor(np.mean([])) = NaN from
        # probability(); it is never used by the loss so it is omitted here.
        if ask_in_ex:
            return loss, pdep, pex
        return loss


# ----------------------------------------------------------------------------
# Pure-numpy reference mirroring the torch code exactly (for verification)
# ----------------------------------------------------------------------------
def _probability_ref(results, length, attrs, groups):
    p = []
    flag = False
    for i in range(length):
        if flag:
            continue
        group_results = results[:, groups[i]].sum(axis=1)
        attr_rows = np.where(results[:, attrs[i]] == 1)[0]
        den = len(attr_rows)
        if den == 0:
            p.append(0.0)          # ZeroDivisionError path in torch
            continue
        num = int((group_results[attr_rows] > 0).sum())
        p.append(num / den)
        flag = True
    return float(np.mean(p)) if len(p) else float("nan")


def _lcp_loss_ref(results, cfg):
    pdep = _probability_ref(results, len(cfg["dep_given_attrs"]),
                            cfg["dep_given_attrs"], cfg["dep_groups"])
    pex = _probability_ref(results, len(cfg["ex_given_attrs"]),
                           cfg["ex_given_attrs"], cfg["ex_groups"])
    return (1.0 - pdep + pex * cfg["alpha"]) ** 2, pdep, pex


# ----------------------------------------------------------------------------
if __name__ == "__main__":
    C = 32
    config = dict(
        num_attrs=C,
        dep_given_attrs=[3, 7, 11],
        dep_groups=[[0, 1, 2], [4, 5, 6], [8, 9, 10]],
        ex_given_attrs=[15, 20],
        ex_groups=[[16, 17, 18, 19], [21, 22]],
        alpha=0.5,
    )

    key = jax.random.PRNGKey(0)
    k1, k2 = jax.random.split(key)

    # --- Test 1: small batch, single-tile path --------------------------------
    N1 = 8
    preds1 = jax.random.bernoulli(k1, 0.5, (N1, C)).astype(jnp.float32)

    mod1 = LCPLossPallas(config)
    loss1, pdep1, pex1 = mod1.forward(preds1, True)
    loss1 = jax.block_until_ready(loss1)
    r_loss1, r_pdep1, r_pex1 = _lcp_loss_ref(np.asarray(preds1), config)
    assert np.allclose(float(pdep1), r_pdep1, atol=1e-6), (float(pdep1), r_pdep1)
    assert np.allclose(float(pex1), r_pex1, atol=1e-6), (float(pex1), r_pex1)
    assert np.allclose(float(loss1), r_loss1, atol=1e-6), (float(loss1), r_loss1)

    # --- Test 2: streamed multi-tile path with a partial last tile and a
    #             zero-denominator first dep attribute -------------------------
    N2 = 20
    preds2 = jax.random.bernoulli(k2, 0.5, (N2, C)).astype(jnp.float32)
    preds2 = preds2.at[:, 3].set(0.0)   # dep attr 0 has den == 0 -> skip path

    mod2 = LCPLossPallas(config, tile_n=8)   # 3 tiles, last one partial (4 rows)
    loss2, pdep2, pex2 = mod2.forward(preds2, True)
    loss2 = jax.block_until_ready(loss2)
    r_loss2, r_pdep2, r_pex2 = _lcp_loss_ref(np.asarray(preds2), config)
    assert np.allclose(float(pdep2), r_pdep2, atol=1e-6), (float(pdep2), r_pdep2)
    assert np.allclose(float(pex2), r_pex2, atol=1e-6), (float(pex2), r_pex2)
    assert np.allclose(float(loss2), r_loss2, atol=1e-6), (float(loss2), r_loss2)

    print("KERNEL_OK")
</pallas_src>

<mosaic_0001>
module attributes {stable_mosaic.version = 11 : i64} {
  func.func @kernel(%arg0: i32, %arg1: memref<8x32xf32, #tpu.memory_space<vmem>>, %arg2: memref<32x512xbf16, #tpu.memory_space<vmem>>, %arg3: memref<1x128xf32, #tpu.memory_space<vmem>>, %arg4: memref<8x256xf32, #tpu.memory_space<vmem>>, %arg5: memref<8x256xf32, #tpu.memory_space<vmem>>) attributes {dimension_semantics = [#tpu.dimension_semantics<arbitrary>], iteration_bounds = array<i64: 1>, scalar_prefetch = 0 : i64, scratch_operands = 2 : i64, tpu.core_type = #tpu.core_type<tc>, window_params = [{transform_indices = @transform_0, window_bounds = array<i64: 8, 32>}, {pipeline_mode = #tpu.pipeline_mode<synchronous>, transform_indices = @transform_1, window_bounds = array<i64: 32, 512>}, {pipeline_mode = #tpu.pipeline_mode<synchronous>, transform_indices = @transform_2, window_bounds = array<i64: 1, 128>}]} {
    %c0_i32 = arith.constant 0 : i32
    %0 = arith.cmpi eq, %arg0, %c0_i32 : i32
    %1 = arith.extui %0 : i1 to i32
    %c0_i32_0 = arith.constant 0 : i32
    %2 = arith.cmpi ne, %1, %c0_i32_0 : i32
    scf.if %2 {
      %cst_19 = arith.constant 0.000000e+00 : f32
      %27 = vector.broadcast %cst_19 : f32 to vector<8x256xf32>
      %c0_20 = arith.constant 0 : index
      %c0_21 = arith.constant 0 : index
      %28 = vector.load %arg4[%c0_20, %c0_21] : memref<8x256xf32, #tpu.memory_space<vmem>>, vector<8x256xf32>
      tpu.vector_store %arg4[%c0_20, %c0_21], %27 {strides = array<i32>} : memref<8x256xf32, #tpu.memory_space<vmem>>, vector<8x256xf32>,
      %cst_22 = arith.constant 0.000000e+00 : f32
      %29 = vector.broadcast %cst_22 : f32 to vector<8x256xf32>
      %c0_23 = arith.constant 0 : index
      %c0_24 = arith.constant 0 : index
      %30 = vector.load %arg5[%c0_23, %c0_24] : memref<8x256xf32, #tpu.memory_space<vmem>>, vector<8x256xf32>
      tpu.vector_store %arg5[%c0_23, %c0_24], %29 {strides = array<i32>} : memref<8x256xf32, #tpu.memory_space<vmem>>, vector<8x256xf32>,
    } else {
    }
    %c0 = arith.constant 0 : index
    %c0_1 = arith.constant 0 : index
    %3 = vector.load %arg1[%c0, %c0_1] : memref<8x32xf32, #tpu.memory_space<vmem>>, vector<8x32xf32>
    %4 = arith.truncf %3 : vector<8x32xf32> to vector<8x32xbf16>
    %c0_2 = arith.constant 0 : index
    %c0_3 = arith.constant 0 : index
    %5 = vector.load %arg2[%c0_2, %c0_3] : memref<32x512xbf16, #tpu.memory_space<vmem>>, vector<32x512xbf16>
    %cst = arith.constant dense<0.000000e+00> : vector<8x512xf32>
    %6 = tpu.matmul %4, %5, %cst {dimension_numbers = #tpu.dot_dimension_numbers<[1], [0], [0], [1], [0, 0, 1, 1], [], []>} : vector<8x32xbf16>, vector<32x512xbf16>, vector<8x512xf32> -> vector<8x512xf32>
    %7 = vector.extract_strided_slice %6 {offsets = [0, 0], sizes = [8, 256], strides = [1, 1]} : vector<8x512xf32> to vector<8x256xf32>
    %8 = vector.extract_strided_slice %6 {offsets = [0, 256], sizes = [8, 256], strides = [1, 1]} : vector<8x512xf32> to vector<8x256xf32>
    %9 = arith.truncf %8 : vector<8x256xf32> to vector<8x256xbf16>
    %cst_4 = arith.constant 0.000000e+00 : f32
    %10 = vector.broadcast %cst_4 : f32 to vector<8x256xf32>
    %11 = arith.cmpf ogt, %7, %10 : vector<8x256xf32>
    %cst_5 = arith.constant 0.000000e+00 : f32
    %12 = vector.broadcast %cst_5 : f32 to vector<8x256xf32>
    %13 = arith.select %11, %8, %12 : vector<8x256xi1>, vector<8x256xf32>
    %14 = arith.truncf %13 : vector<8x256xf32> to vector<8x256xbf16>
    %cst_6 = arith.constant 1.000000e+00 : bf16
    %15 = vector.broadcast %cst_6 : bf16 to vector<8x8xbf16>
    %c0_7 = arith.constant 0 : index
    %c0_8 = arith.constant 0 : index
    %16 = vector.load %arg4[%c0_7, %c0_8] : memref<8x256xf32, #tpu.memory_space<vmem>>, vector<8x256xf32>
    %cst_9 = arith.constant dense<0.000000e+00> : vector<8x256xf32>
    %17 = tpu.matmul %15, %14, %cst_9 {dimension_numbers = #tpu.dot_dimension_numbers<[1], [0], [0], [1], [0, 0, 1, 1], [], []>} : vector<8x8xbf16>, vector<8x256xbf16>, vector<8x256xf32> -> vector<8x256xf32>
    %18 = arith.addf %16, %17 : vector<8x256xf32>
    %c0_10 = arith.constant 0 : index
    %c0_11 = arith.constant 0 : index
    %19 = vector.load %arg4[%c0_10, %c0_11] : memref<8x256xf32, #tpu.memory_space<vmem>>, vector<8x256xf32>
    tpu.vector_store %arg4[%c0_10, %c0_11], %18 {strides = array<i32>} : memref<8x256xf32, #tpu.memory_space<vmem>>, vector<8x256xf32>,
    %c0_12 = arith.constant 0 : index
    %c0_13 = arith.constant 0 : index
    %20 = vector.load %arg5[%c0_12, %c0_13] : memref<8x256xf32, #tpu.memory_space<vmem>>, vector<8x256xf32>
    %cst_14 = arith.constant dense<0.000000e+00> : vector<8x256xf32>
    %21 = tpu.matmul %15, %9, %cst_14 {dimension_numbers = #tpu.dot_dimension_numbers<[1], [0], [0], [1], [0, 0, 1, 1], [], []>} : vector<8x8xbf16>, vector<8x256xbf16>, vector<8x256xf32> -> vector<8x256xf32>
    %22 = arith.addf %20, %21 : vector<8x256xf32>
    %c0_15 = arith.constant 0 : index
    %c0_16 = arith.constant 0 : index
    %23 = vector.load %arg5[%c0_15, %c0_16] : memref<8x256xf32, #tpu.memory_space<vmem>>, vector<8x256xf32>
    tpu.vector_store %arg5[%c0_15, %c0_16], %22 {strides = array<i32>} : memref<8x256xf32, #tpu.memory_space<vmem>>, vector<8x256xf32>,
    %c0_i32_17 = arith.constant 0 : i32
    %24 = arith.cmpi eq, %arg0, %c0_i32_17 : i32
    %25 = arith.extui %24 : i1 to i32
    %c0_i32_18 = arith.constant 0 : i32
    %26 = arith.cmpi ne, %25, %c0_i32_18 : i32
    scf.if %26 {
      %c0_19 = arith.constant 0 : index
      %c0_20 = arith.constant 0 : index
      %27 = vector.load %arg4[%c0_19, %c0_20] : memref<8x256xf32, #tpu.memory_space<vmem>>, vector<1x256xf32>
      %c0_21 = arith.constant 0 : index
      %c0_22 = arith.constant 0 : index
      %28 = vector.load %arg5[%c0_21, %c0_22] : memref<8x256xf32, #tpu.memory_space<vmem>>, vector<1x256xf32>
      %29 = tpu.iota {dimensions = array<i32: 1>} : vector<1x128xi32>
      %30 = arith.sitofp %29 : vector<1x128xi32> to vector<1x128xf32>
      %31 = vector.extract_strided_slice %27 {offsets = [0, 0], sizes = [1, 128], strides = [1, 1]} : vector<1x256xf32> to vector<1x128xf32>
      %32 = vector.extract_strided_slice %28 {offsets = [0, 0], sizes = [1, 128], strides = [1, 1]} : vector<1x256xf32> to vector<1x128xf32>
      %c3_i32 = arith.constant 3 : i32
      %33 = vector.broadcast %c3_i32 : i32 to vector<1x128xi32>
      %34 = arith.cmpi slt, %29, %33 : vector<1x128xi32>
      %cst_23 = arith.constant 0.000000e+00 : f32
      %35 = vector.broadcast %cst_23 : f32 to vector<1x128xf32>
      %36 = arith.cmpf ogt, %32, %35 : vector<1x128xf32>
      %37 = arith.andi %34, %36 : vector<1x128xi1>
      %cst_24 = arith.constant 1.000000e+09 : f32
      %38 = vector.broadcast %cst_24 : f32 to vector<1x128xf32>
      %39 = arith.select %37, %30, %38 : vector<1x128xi1>, vector<1x128xf32>
      %cst_25 = arith.constant dense<0x7F800000> : vector<1xf32>
      %40 = vector.multi_reduction <minimumf>, %39, %cst_25 [1] : vector<1x128xf32> to vector<1xf32>
      %41 = vector.shape_cast %40 : vector<1xf32> to vector<1x1xf32>
      %cst_26 = arith.constant 1.000000e+09 : f32
      %42 = vector.broadcast %cst_26 : f32 to vector<1x1xf32>
      %43 = arith.cmpf olt, %41, %42 : vector<1x1xf32>
      %cst_27 = arith.constant 1.000000e+00 : f32
      %44 = vector.broadcast %cst_27 : f32 to vector<1x128xf32>
      %45 = arith.maximumf %32, %44 : vector<1x128xf32>
      %46 = arith.divf %31, %45 : vector<1x128xf32>
      %cst_28 = arith.constant 1.000000e+00 : f32
      %47 = vector.broadcast %cst_28 : f32 to vector<1x128xf32>
      %48 = arith.addf %30, %47 : vector<1x128xf32>
      %49 = arith.divf %46, %48 : vector<1x128xf32>
      %50 = vector.broadcast %41 : vector<1x1xf32> to vector<1x128xf32>
      %51 = arith.cmpf oeq, %30, %50 : vector<1x128xf32>
      %52 = arith.andi %37, %51 : vector<1x128xi1>
      %cst_29 = arith.constant 0.000000e+00 : f32
      %53 = vector.broadcast %cst_29 : f32 to vector<1x128xf32>
      %54 = arith.select %52, %49, %53 : vector<1x128xi1>, vector<1x128xf32>
      %cst_30 = arith.constant dense<0.000000e+00> : vector<1xf32>
      %55 = vector.multi_reduction <add>, %54, %cst_30 [1] : vector<1x128xf32> to vector<1xf32>
      %56 = vector.shape_cast %55 : vector<1xf32> to vector<1x1xf32>
      %cst_31 = arith.constant 0.000000e+00 : f32
      %57 = vector.broadcast %cst_31 : f32 to vector<1x1xf32>
      %58 = arith.select %43, %56, %57 : vector<1x1xi1>, vector<1x1xf32>
      %59 = vector.extract_strided_slice %27 {offsets = [0, 128], sizes = [1, 128], strides = [1, 1]} : vector<1x256xf32> to vector<1x128xf32>
      %60 = vector.extract_strided_slice %28 {offsets = [0, 128], sizes = [1, 128], strides = [1, 1]} : vector<1x256xf32> to vector<1x128xf32>
      %c2_i32 = arith.constant 2 : i32
      %61 = vector.broadcast %c2_i32 : i32 to vector<1x128xi32>
      %62 = arith.cmpi slt, %29, %61 : vector<1x128xi32>
      %cst_32 = arith.constant 0.000000e+00 : f32
      %63 = vector.broadcast %cst_32 : f32 to vector<1x128xf32>
      %64 = arith.cmpf ogt, %60, %63 : vector<1x128xf32>
      %65 = arith.andi %62, %64 : vector<1x128xi1>
      %cst_33 = arith.constant 1.000000e+09 : f32
      %66 = vector.broadcast %cst_33 : f32 to vector<1x128xf32>
      %67 = arith.select %65, %30, %66 : vector<1x128xi1>, vector<1x128xf32>
      %cst_34 = arith.constant dense<0x7F800000> : vector<1xf32>
      %68 = vector.multi_reduction <minimumf>, %67, %cst_34 [1] : vector<1x128xf32> to vector<1xf32>
      %69 = vector.shape_cast %68 : vector<1xf32> to vector<1x1xf32>
      %cst_35 = arith.constant 1.000000e+09 : f32
      %70 = vector.broadcast %cst_35 : f32 to vector<1x1xf32>
      %71 = arith.cmpf olt, %69, %70 : vector<1x1xf32>
      %cst_36 = arith.constant 1.000000e+00 : f32
      %72 = vector.broadcast %cst_36 : f32 to vector<1x128xf32>
      %73 = arith.maximumf %60, %72 : vector<1x128xf32>
      %74 = arith.divf %59, %73 : vector<1x128xf32>
      %cst_37 = arith.constant 1.000000e+00 : f32
      %75 = vector.broadcast %cst_37 : f32 to vector<1x128xf32>
      %76 = arith.addf %30, %75 : vector<1x128xf32>
      %77 = arith.divf %74, %76 : vector<1x128xf32>
      %78 = vector.broadcast %69 : vector<1x1xf32> to vector<1x128xf32>
      %79 = arith.cmpf oeq, %30, %78 : vector<1x128xf32>
      %80 = arith.andi %65, %79 : vector<1x128xi1>
      %cst_38 = arith.constant 0.000000e+00 : f32
      %81 = vector.broadcast %cst_38 : f32 to vector<1x128xf32>
      %82 = arith.select %80, %77, %81 : vector<1x128xi1>, vector<1x128xf32>
      %cst_39 = arith.constant dense<0.000000e+00> : vector<1xf32>
      %83 = vector.multi_reduction <add>, %82, %cst_39 [1] : vector<1x128xf32> to vector<1xf32>
      %84 = vector.shape_cast %83 : vector<1xf32> to vector<1x1xf32>
      %cst_40 = arith.constant 0.000000e+00 : f32
      %85 = vector.broadcast %cst_40 : f32 to vector<1x1xf32>
      %86 = arith.select %71, %84, %85 : vector<1x1xi1>, vector<1x1xf32>
      %cst_41 = arith.constant 1.000000e+00 : f32
      %87 = vector.broadcast %cst_41 : f32 to vector<1x1xf32>
      %88 = arith.subf %87, %58 : vector<1x1xf32>
      %cst_42 = arith.constant 5.000000e-01 : f32
      %89 = vector.broadcast %cst_42 : f32 to vector<1x1xf32>
      %90 = arith.mulf %86, %89 : vector<1x1xf32>
      %91 = arith.addf %88, %90 : vector<1x1xf32>
      %92 = arith.mulf %91, %91 : vector<1x1xf32>
      %93 = tpu.iota {dimensions = array<i32: 1>} : vector<1x128xi32>
      %c0_i32_43 = arith.constant 0 : i32
      %94 = vector.broadcast %c0_i32_43 : i32 to vector<1x128xi32>
      %95 = arith.cmpi eq, %93, %94 : vector<1x128xi32>
      %c1_i32 = arith.constant 1 : i32
      %96 = vector.broadcast %c1_i32 : i32 to vector<1x128xi32>
      %97 = arith.cmpi eq, %93, %96 : vector<1x128xi32>
      %c2_i32_44 = arith.constant 2 : i32
      %98 = vector.broadcast %c2_i32_44 : i32 to vector<1x128xi32>
      %99 = arith.cmpi eq, %93, %98 : vector<1x128xi32>
      %cst_45 = arith.constant 0.000000e+00 : f32
      %100 = vector.shape_cast %86 : vector<1x1xf32> to vector<1x1xf32>
      %101 = vector.broadcast %100 : vector<1x1xf32> to vector<1x128xf32>
      %102 = vector.broadcast %cst_45 : f32 to vector<1x128xf32>
      %103 = arith.select %99, %101, %102 : vector<1x128xi1>, vector<1x128xf32>
      %104 = vector.shape_cast %58 : vector<1x1xf32> to vector<1x1xf32>
      %105 = vector.broadcast %104 : vector<1x1xf32> to vector<1x128xf32>
      %106 = arith.select %97, %105, %103 : vector<1x128xi1>, vector<1x128xf32>
      %107 = vector.shape_cast %92 : vector<1x1xf32> to vector<1x1xf32>
      %108 = vector.broadcast %107 : vector<1x1xf32> to vector<1x128xf32>
      %109 = arith.select %95, %108, %106 : vector<1x128xi1>, vector<1x128xf32>
      %c0_46 = arith.constant 0 : index
      %c0_47 = arith.constant 0 : index
      %110 = vector.load %arg3[%c0_46, %c0_47] : memref<1x128xf32, #tpu.memory_space<vmem>>, vector<1x128xf32>
      tpu.vector_store %arg3[%c0_46, %c0_47], %109 {strides = array<i32>} : memref<1x128xf32, #tpu.memory_space<vmem>>, vector<1x128xf32>,
    } else {
    }
    return
  }
  func.func @transform_0(%arg0: i32) -> (i32, i32) {
    %c0_i32 = arith.constant 0 : i32
    %c0_i32_0 = arith.constant 0 : i32
    return %arg0, %c0_i32 : i32, i32
  }
  func.func @transform_1(%arg0: i32) -> (i32, i32) {
    %c0_i32 = arith.constant 0 : i32
    %c0_i32_0 = arith.constant 0 : i32
    %c0_i32_1 = arith.constant 0 : i32
    return %c0_i32, %c0_i32_0 : i32, i32
  }
  func.func @transform_2(%arg0: i32) -> (i32, i32) {
    %c0_i32 = arith.constant 0 : i32
    %c0_i32_0 = arith.constant 0 : i32
    %c0_i32_1 = arith.constant 0 : i32
    return %c0_i32, %c0_i32_0 : i32, i32
  }
}

</mosaic_0001>

<bundles_post_ra>
// kernel: forward.1
= control target key start
LH: loop header
LB: loop body
LE: loop exit
PB: predicated region body
PF: predicated region fallthrough
CT: control target
= control target key end

     0   :  { %v381_v1 = vmov 0   ;;  %vm71_vm0 = vcmask 261120   ;;  %vm171_vm1 = vcmask 1043456   ;;  %vm167_vm4 = vcmask 64512   ;;  %s460_s1 = inlined_call_operand.vmem [shape: bf16[32,512], index: 1, kind: input, shape index: {}]   ;;  %s461_s0 = inlined_call_operand.vmem [shape: f32[8,32], index: 0, kind: input, shape index: {}]   ;;  %s462_s2 = inlined_call_operand.vmem [shape: f32[1,128], index: 2, kind: output, shape index: {}]  }
   0x1   :  { %v363_v0 = vld [vmem:[%s460_s1 + $0x4] ss:$16 sps:$4 sm:$0xff]   ;;  %107 = vmatprep.mubr.bf16.mxu0 %v381_v1  ;;  %148 = vmatprep.mubr.bf16.mxu1 %v381_v1  ;;  %v365_v2 = vld [vmem:[%s460_s1 + $0xc] ss:$16 sps:$4 sm:$0xff]   ;;  %v367_v3 = vld [vmem:[%s460_s1] ss:$16 sps:$4 sm:$0xff]   ;;  %v281_v31 = vlaneseq }
   0x2   :  { %75 = vmatprep.subr.bf16.mxu0 %v363_v0  ;;  %v368_v4 = vld [vmem:[%s460_s1 + $0x8] ss:$16 sps:$4 sm:$0xff]   ;;  %116 = vmatprep.subr.bf16.mxu1 %v365_v2  ;;  %v369_v5 = vld [vmem:[%s460_s1 + $0x24] ss:$16 sps:$4 sm:$0xff]   ;;  %v371_v6 = vld [vmem:[%s460_s1 + $0x2c] ss:$16 sps:$4 sm:$0xff]  }
   0x3   :  { %76 = vmatpush1.bf16.msra.mxu0 %v367_v3  ;;  %117 = vmatpush1.bf16.msra.mxu1 %v368_v4  ;;  %v373_v7 = vld [vmem:[%s460_s1 + $0x20] ss:$16 sps:$4 sm:$0xff]   ;;  %v374_v8 = vld [vmem:[%s460_s1 + $0x28] ss:$16 sps:$4 sm:$0xff]   ;;  %v382_v27 = vmov 1065369472  }
   0x4   :  { %77 = vmatprep.subr.bf16.mxu0 %v369_v5  ;;  %v21_v9 = vld [vmem:[%s461_s0] sm:$0xff]  ;;  %118 = vmatprep.subr.bf16.mxu1 %v371_v6  ;;  %v429_v37 = vand.u32 127, %v281_v31  ;;  %vm288_vm7 = vcmask 1040384  }
   0x5   :  { %v22_v10 = vpack.c.bf16 %v21_v9, %v21_v9 }
   0x6   :  { %v283_v38 = vcvt.s32.f32 %v429_v37  ;;  %vm284_vm5 = vcmp.lt.s32.totalorder %v429_v37, 3  ;;  %vm306_vm8 = vcmp.lt.s32.totalorder %v429_v37, 2 }
   0x7   :  { %78 = vmatpush1.bf16.msra.mxu0 %v373_v7  ;;  %119 = vmatpush1.bf16.msra.mxu1 %v374_v8 }
   0x8   :  { %v296_v48 = vadd.f32 1.0, %v283_v38 }
   0xa   :  { %354 = vmatmul.mubr.msk.bf16.vlgmr.msra.gmra.mrb[0].mxu0 %vm71_vm0, %v22_v10  ;;  %355 = vmatmul.mubr.msk.bf16.vlgmr.msra.gmra.mrb[0].mxu1 %vm71_vm0, %v22_v10 }
   0xb   :  { %263 = vmatprep.mubr.bf16.mxu1 %v381_v1  ;;  %210 = vmatprep.mubr.bf16.mxu0 %v381_v1 }
  0xdd   :  { %v109_v11 = vpop.f32.mrb[0].mxu0  ;;  %v150_v12 = vpop.f32.mrb[0].mxu1 }
  0xde   :  { %vm159_vm2 = vcmp.gt.f32.partialorder %v109_v11, 0.0  ;;  %v157_v13 = vpack.c.bf16 %v150_v12, %v150_v12  ;;  %v111_v14 = vpop.f32.mrb[1].mxu0  ;;  %v152_v15 = vpop.f32.mrb[1].mxu1 }
  0xdf   :  { %v161_v16 = vsel %vm159_vm2, %v150_v12, 0.0  ;;  %vm160_vm3 = vcmp.gt.f32.partialorder %v111_v14, 0.0  ;;  %v158_v17 = vpack.c.bf16 %v152_v15, %v152_v15  ;;  %v154_v18 = vpop.f32.mrb[2].mxu1  ;;  %v113_v19 = vpop.f32.mrb[2].mxu0 }
  0xe0   :  { %v163_v20 = vpack.c.bf16 %v161_v16, %v161_v16  ;;  %v162_v21 = vsel %vm160_vm3, %v152_v15, 0.0  ;;  %v155_v22 = vpop.f32.mrb[3].mxu1  ;;  %v226_v23 = vsel %vm171_vm1, %v157_v13, 0  ;;  %v114_v24 = vpop.f32.mrb[3].mxu0  ;;  %vm336_vm3 = vcmp.eq.s32.totalorder %v429_v37, 1 }
  0xe1   :  { %v164_v25 = vpack.c.bf16 %v162_v21, %v162_v21  ;;  %358 = vmatprep.subr.msk.bf16.mxu1 %vm171_vm1, %v158_v17 }
  0xe2   :  { %232 = vmatpush1.bf16.msra.mxu1 %v226_v23  ;;  %v173_v26 = vsel %vm171_vm1, %v163_v20, 0 }
  0xe3   :  { %356 = vmatprep.subr.msk.bf16.mxu0 %vm171_vm1, %v164_v25  ;;  %vm337_vm1 = vcmp.eq.s32.totalorder %v429_v37, 2 }
  0xe4   :  { %179 = vmatpush1.bf16.msra.mxu0 %v173_v26 }
  0xe5   :  { %359 = vmatmul.mubr.msk.bf16.vlgmr.msra.gmra.mrb[4].mxu1 %vm167_vm4, %v382_v27 }
  0xe7   :  { %357 = vmatmul.mubr.msk.bf16.vlgmr.msra.gmra.mrb[4].mxu0 %vm167_vm4, %v382_v27  ;;  %vm335_vm4 = vcmp.eq.s32.totalorder %v429_v37, 0 }
 0x1b8   :  { %v265_v28 = vpop.f32.mrb[4].mxu1 }
 0x1b9   :  { %v267_v29 = vpop.f32.mrb[5].mxu1  ;;  %274 = vst [vmem:[#allocation3] sm:$0xff] %v265_v28 }
 0x1ba   :  { %v269_v30 = vpop.f32.mrb[6].mxu1  ;;  %v212_v32 = vpop.f32.mrb[4].mxu0  ;;  %275 = vst [vmem:[#allocation3 + $0x8] sm:$0xff] %v267_v29 }
 0x1bb   :  { %v270_v33 = vpop.f32.mrb[7].mxu1  ;;  %v214_v34 = vpop.f32.mrb[5].mxu0  ;;  %221 = vst [vmem:[#allocation2] sm:$0xff] %v212_v32 }
 0x1bc   :  { %v216_v35 = vpop.f32.mrb[6].mxu0  ;;  %222 = vst [vmem:[#allocation2 + $0x8] sm:$0xff] %v214_v34 }
 0x1bd   :  { %v217_v36 = vpop.f32.mrb[7].mxu0 }
 0x1c1   :  { %v280_v39 = vld [vmem:[#allocation3] ss:$8 sm:$0x3] }
 0x1c2   :  { %vm285_vm6 = vcmp.gt.f32.partialorder %v280_v39, 0.0  ;;  %v308_v40 = vrot.slane %v280_v39, 1  ;;  %v293_v47 = vmax.f32 %v280_v39, 1.0 }
 0x1c3   :  { %vm434_vm9 = vmand %vm284_vm5, %vm285_vm6  ;;  %v279_v51 = vld [vmem:[#allocation2] ss:$8 sm:$0x3] }
 0x1c4   :  { %v287_v42 = vsel %vm434_vm9, %v283_v38, 1e+09  ;;  %vm310_vm10 = vcmp.gt.f32.partialorder %v308_v40, 0.0  ;;  %375 = vrcp.f32 %v293_v47  ;;  %v317_v49 = vmax.f32 %v308_v40, 1.0 }
 0x1c5   :  { %v289_v43 = vsel %vm288_vm7, %v287_v42, inf  ;;  %vm441_vm11 = vmand %vm306_vm8, %vm310_vm10  ;;  %377 = vrcp.f32 %v296_v48  ;;  %v319_v54 = vrot.slane %v279_v51, 1 }
 0x1c6   :  { %290 = vmin.xlane.f32.xlu0 %v289_v43  ;;  %v312_v45 = vsel %vm441_vm11, %v283_v38, 1e+09  ;;  %379 = vrcp.f32 %v317_v49 }
 0x1c7   :  { %v313_v46 = vsel %vm288_vm7, %v312_v45, inf }
 0x1ca   :  { %314 = vmin.xlane.f32.xlu0 %v313_v46 }
 0x1ce   :  { %v376_v50 = vpop.eup %375 }
 0x1cf   :  { %v378_v52 = vpop.eup %377  ;;  %v295_v53 = vmul.f32 %v376_v50, %v279_v51 }
 0x1d0   :  { %v380_v55 = vpop.eup %379 }
 0x1d1   :  { %v298_v57 = vmul.f32 %v378_v52, %v295_v53  ;;  %v322_v58 = vmul.f32 %v380_v55, %v319_v54 }
 0x1d3   :  { %v323_v62 = vmul.f32 %v378_v52, %v322_v58 }
 0x253   :  { %v291_v56 = vpop.xlane.xlu0 %290 }
 0x254   :  { %vm299_vm12 = vcmp.eq.f32.partialorder %v283_v38, %v291_v56  ;;  %vm292_vm0 = vcmp.lt.f32.partialorder %v291_v56, 1e+09 }
 0x255   :  { %vm300_vm13 = vmand %vm434_vm9, %vm299_vm12 }
 0x256   :  { %v301_v59 = vsel %vm300_vm13, %v298_v57, 0.0 }
 0x257   :  { %v315_v60 = vpop.xlane.xlu0 %314  ;;  %v302_v61 = vsel %vm288_vm7, %v301_v59, 0.0 }
 0x258   :  { %vm324_vm14 = vcmp.eq.f32.partialorder %v283_v38, %v315_v60  ;;  %303 = vadd.xlane.f32.xlu1 %v302_v61  ;;  %vm316_vm2 = vcmp.lt.f32.partialorder %v315_v60, 1e+09 }
 0x259   :  { %vm325_vm15 = vmand %vm441_vm11, %vm324_vm14 }
 0x25a   :  { %v326_v63 = vsel %vm325_vm15, %v323_v62, 0.0 }
 0x25b   :  { %v327_v0 = vsel %vm288_vm7, %v326_v63, 0.0 }
 0x25c   :  { %328 = vadd.xlane.f32.xlu1 %v327_v0 }
 0x2e5   :  { %v304_v1 = vpop.xlane.xlu1 %303 }
 0x2e6   :  { %v305_v2 = vsel %vm292_vm0, %v304_v1, 0.0 }
 0x2e7   :  { %v331_v5 = vsub.f32 1.0, %v305_v2 }
 0x2e9   :  { %v329_v3 = vpop.xlane.xlu1 %328 }
 0x2ea   :  { %v330_v4 = vsel %vm316_vm2, %v329_v3, 0.0 }
 0x2eb   :  { %v332_v6 = vmul.f32 0.5, %v330_v4  ;;  %v338_v7 = vsel %vm337_vm1, %v330_v4, 0.0 }
 0x2ec   :  { %v339_v8 = vsel %vm336_vm3, %v305_v2, %v338_v7 }
 0x2ed   :  { %v333_v9 = vadd.f32 %v332_v6, %v331_v5 }
 0x2ef   :  { %v334_v10 = vmul.f32 %v333_v9, %v333_v9 }
 0x2f1   :  { %v340_v11 = vsel %vm335_vm4, %v334_v10, %v339_v8 }
 0x2f2   :  { %341 = vst [vmem:[%s462_s2] sm:$0x1] %v340_v11 }

</bundles_post_ra>
